<compile_context>
chip_gen: v6e
topology: v6e:2x2x1
jax: 0.10.0
libtpu: 0.0.40
codegen_flags: <defaults>
</compile_context>

<pallas_src>
import math

import jax
import jax.numpy as jnp
from jax.experimental import pallas as pl
from jax.experimental.pallas import tpu as pltpu


def _round_up(n, m):
    return ((n + m - 1) // m) * m


def _choose_tile(B, block_b, min_split=512):
    """Pick batch tile (tb) and padded batch (pb).

    - tiles capped at block_b rows,
    - adaptive tb (multiple of 8) so padding waste stays small,
    - for large single-tile batches, split into 2 tiles so v7x's two
      TensorCores both get work on the "parallel" batch grid axis.
    """
    n_tiles = -(-B // block_b)              # ceil div
    if n_tiles == 1 and B >= min_split:
        n_tiles = 2
    tb = _round_up(-(-B // n_tiles), 8)
    pb = _round_up(B, tb)
    return tb, pb


def mlp_base_kernel(x_ref, w1_ref, w2_ref, c_ref, out_ref):
    # Packed constants (8, 2H):
    #   row 0: b1 = [b1a | b1c]
    #   row 1: b2 = [b2a | b2c]
    #   row 2: wcl zero-padded over actor lanes (critic_linear weight)
    #   row 3: zeros except lane H = bcl (critic_linear bias)
    b1 = c_ref[0:1, :]
    b2 = c_ref[1:2, :]
    wcl = c_ref[2:3, :]
    bcl_row = c_ref[3:4, :]

    x = x_ref[...]

    # Fused layer 1: one (tb, num_inputs) @ (num_inputs, 2H) matmul -> [h1a | h1c].
    h1 = jnp.tanh(jnp.dot(x, w1_ref[...], preferred_element_type=jnp.float32) + b1)

    # Fused layer 2: block-diagonal (2H, 2H) weight keeps branches independent,
    # one lane-dense matmul -> h2 = [ha | hc].
    h2 = jnp.tanh(jnp.dot(h1, w2_ref[...], preferred_element_type=jnp.float32) + b2)

    # critic_linear head: wcl is zero over the actor lanes, so an elementwise
    # multiply + lane reduction (VPU/XLU) gives hc @ wcl (bias added below).
    v = jnp.sum(h2 * wcl, axis=-1, keepdims=True)          # (tb, 1)

    # Inject the value into lane H of the hidden slab (critic lanes are dead
    # data downstream); bcl_row adds the bias only at lane H. One lane-dense
    # (tb, 2H) output instead of a separate 128-lane value slab.
    H = h2.shape[1] // 2
    lane = jax.lax.broadcasted_iota(jnp.int32, h2.shape, dimension=1)
    out = jnp.where(lane == H, v, h2) + bcl_row
    out_ref[...] = out.astype(out_ref.dtype)


def mlp_base_forward(x, fused, *, block_b=2048, return_packed=False):
    """x: (B, num_inputs) float32.

    Returns (value (B, 1), hidden_actor (B, H)). With return_packed=True,
    returns the raw (pb, 2H) slab (actor in lanes [:H], value in lane H,
    rows [:B] valid) so consumers can slice lazily and avoid an extra
    HBM round-trip.
    """
    B, num_inputs = x.shape
    H2 = fused["w1"].shape[1]          # 2 * hidden_size
    H = H2 // 2

    tb, pb = _choose_tile(B, block_b)
    if pb != B:
        x = jnp.pad(x, ((0, pb - B), (0, 0)))
    grid = (pb // tb,)

    out = pl.pallas_call(
        mlp_base_kernel,
        out_shape=jax.ShapeDtypeStruct((pb, H2), jnp.float32),
        grid_spec=pltpu.PrefetchScalarGridSpec(
            num_scalar_prefetch=0,
            grid=grid,
            in_specs=[
                pl.BlockSpec((tb, num_inputs), lambda i: (i, 0)),   # x tile
                pl.BlockSpec((num_inputs, H2), lambda i: (0, 0)),   # W1 (resident)
                pl.BlockSpec((H2, H2), lambda i: (0, 0)),           # W2 (block-diag)
                pl.BlockSpec((8, H2), lambda i: (0, 0)),            # packed consts
            ],
            out_specs=pl.BlockSpec((tb, H2), lambda i: (i, 0)),     # [ha | value | hc...]
        ),
        compiler_params=pltpu.CompilerParams(
            dimension_semantics=("parallel",)),
    )(x, fused["w1"], fused["w2"], fused["consts"])

    if return_packed:
        return out
    value = out[:B, H:H + 1]
    hidden_actor = out[:B, :H]
    return value, hidden_actor


def init_params(key, num_inputs, hidden_size=64):
    """Orthogonal weights (gain sqrt(2)), zero biases — matches the PyTorch init.
    Weights stored as (in, out)."""
    gain = math.sqrt(2.0)
    ortho = jax.nn.initializers.orthogonal(scale=gain)
    ks = jax.random.split(key, 5)

    def lin(k, fan_in, fan_out):
        # torch orthogonal_ initializes the (out, in) matrix; transpose to (in, out).
        w = ortho(k, (fan_out, fan_in), jnp.float32).T
        b = jnp.zeros((1, fan_out), jnp.float32)
        return w, b

    w1a, b1a = lin(ks[0], num_inputs, hidden_size)
    w2a, b2a = lin(ks[1], hidden_size, hidden_size)
    w1c, b1c = lin(ks[2], num_inputs, hidden_size)
    w2c, b2c = lin(ks[3], hidden_size, hidden_size)
    wcl, bcl = lin(ks[4], hidden_size, 1)

    return dict(w1a=w1a, b1a=b1a, w2a=w2a, b2a=b2a,
                w1c=w1c, b1c=b1c, w2c=w2c, b2c=b2c,
                wcl=wcl, bcl=bcl)


def fuse_params(p):
    """Host-side fusion: actor/critic layer-1 concatenated 128-wide, layer-2
    block-diagonal, and all tiny constants packed into one (8, 128) operand."""
    H = p["w2a"].shape[0]
    H2 = 2 * H

    w1 = jnp.concatenate([p["w1a"], p["w1c"]], axis=1)            # (in, 2H)
    w2 = jnp.zeros((H2, H2), jnp.float32)
    w2 = w2.at[:H, :H].set(p["w2a"]).at[H:, H:].set(p["w2c"])     # block-diag (2H, 2H)

    b1 = jnp.concatenate([p["b1a"], p["b1c"]], axis=1)            # (1, 2H)
    b2 = jnp.concatenate([p["b2a"], p["b2c"]], axis=1)            # (1, 2H)
    wcl = jnp.concatenate([jnp.zeros((1, H), jnp.float32), p["wcl"].T], axis=1)  # (1, 2H)
    bcl_row = jnp.zeros((1, H2), jnp.float32).at[0, H].set(p["bcl"][0, 0])       # bcl at lane H

    consts = jnp.zeros((8, H2), jnp.float32)
    consts = (consts.at[0:1, :].set(b1)
                    .at[1:2, :].set(b2)
                    .at[2:3, :].set(wcl)
                    .at[3:4, :].set(bcl_row))

    return dict(w1=w1, w2=w2, consts=consts)


def reference_forward(x, p):
    hc = jnp.tanh(x @ p["w1c"] + p["b1c"])
    hc = jnp.tanh(hc @ p["w2c"] + p["b2c"])
    value = hc @ p["wcl"] + p["bcl"]
    ha = jnp.tanh(x @ p["w1a"] + p["b1a"])
    ha = jnp.tanh(ha @ p["w2a"] + p["b2a"])
    return value, ha


if __name__ == "__main__":
    num_inputs, hidden_size, batch = 32, 64, 10   # batch=10 exercises the pad path
    key = jax.random.PRNGKey(0)
    k_x, k_p = jax.random.split(key)

    x = jax.random.normal(k_x, (batch, num_inputs), jnp.float32)
    raw = init_params(k_p, num_inputs, hidden_size)
    fused = fuse_params(raw)

    value, actor = mlp_base_forward(x, fused)
    jax.block_until_ready((value, actor))

    v_ref, a_ref = reference_forward(x, raw)
    assert value.shape == (batch, 1) and actor.shape == (batch, hidden_size)
    assert jnp.allclose(value, v_ref, atol=1e-5, rtol=1e-5)
    assert jnp.allclose(actor, a_ref, atol=1e-5, rtol=1e-5)

    # Also sanity-check a larger batch that takes the multi-tile path.
    big_b = 1500
    xb = jax.random.normal(jax.random.PRNGKey(1), (big_b, num_inputs), jnp.float32)
    vb, ab = mlp_base_forward(xb, fused)
    jax.block_until_ready((vb, ab))
    vb_ref, ab_ref = reference_forward(xb, raw)
    assert jnp.allclose(vb, vb_ref, atol=1e-5, rtol=1e-5)
    assert jnp.allclose(ab, ab_ref, atol=1e-5, rtol=1e-5)

    print("KERNEL_OK")
</pallas_src>

<mosaic_0001>
module attributes {stable_mosaic.version = 11 : i64} {
  func.func @mlp_base_kernel(%arg0: i32, %arg1: memref<16x32xf32, #tpu.memory_space<vmem>>, %arg2: memref<32x128xf32, #tpu.memory_space<vmem>>, %arg3: memref<128x128xf32, #tpu.memory_space<vmem>>, %arg4: memref<8x128xf32, #tpu.memory_space<vmem>>, %arg5: memref<16x128xf32, #tpu.memory_space<vmem>>) attributes {dimension_semantics = [#tpu.dimension_semantics<parallel>], iteration_bounds = array<i64: 1>, scalar_prefetch = 0 : i64, scratch_operands = 0 : i64, tpu.core_type = #tpu.core_type<tc>, window_params = [{transform_indices = @transform_0, window_bounds = array<i64: 16, 32>}, {pipeline_mode = #tpu.pipeline_mode<synchronous>, transform_indices = @transform_1, window_bounds = array<i64: 32, 128>}, {pipeline_mode = #tpu.pipeline_mode<synchronous>, transform_indices = @transform_2, window_bounds = array<i64: 128, 128>}, {pipeline_mode = #tpu.pipeline_mode<synchronous>, transform_indices = @transform_3, window_bounds = array<i64: 8, 128>}, {transform_indices = @transform_4, window_bounds = array<i64: 16, 128>}]} {
    %c0 = arith.constant 0 : index
    %c0_0 = arith.constant 0 : index
    %0 = vector.load %arg4[%c0, %c0_0] : memref<8x128xf32, #tpu.memory_space<vmem>>, vector<1x128xf32>
    %c1 = arith.constant 1 : index
    %c0_1 = arith.constant 0 : index
    %1 = vector.load %arg4[%c1, %c0_1] : memref<8x128xf32, #tpu.memory_space<vmem>>, vector<1x128xf32>
    %c2 = arith.constant 2 : index
    %c0_2 = arith.constant 0 : index
    %2 = vector.load %arg4[%c2, %c0_2] : memref<8x128xf32, #tpu.memory_space<vmem>>, vector<1x128xf32>
    %c3 = arith.constant 3 : index
    %c0_3 = arith.constant 0 : index
    %3 = vector.load %arg4[%c3, %c0_3] : memref<8x128xf32, #tpu.memory_space<vmem>>, vector<1x128xf32>
    %c0_4 = arith.constant 0 : index
    %c0_5 = arith.constant 0 : index
    %4 = vector.load %arg1[%c0_4, %c0_5] : memref<16x32xf32, #tpu.memory_space<vmem>>, vector<16x32xf32>
    %c0_6 = arith.constant 0 : index
    %c0_7 = arith.constant 0 : index
    %5 = vector.load %arg2[%c0_6, %c0_7] : memref<32x128xf32, #tpu.memory_space<vmem>>, vector<32x128xf32>
    %cst = arith.constant dense<0.000000e+00> : vector<16x128xf32>
    %6 = tpu.matmul %4, %5, %cst {dimension_numbers = #tpu.dot_dimension_numbers<[1], [0], [0], [1], [0, 0, 1, 1], [], []>} : vector<16x32xf32>, vector<32x128xf32>, vector<16x128xf32> -> vector<16x128xf32>
    %7 = vector.broadcast %0 : vector<1x128xf32> to vector<16x128xf32>
    %8 = arith.addf %6, %7 : vector<16x128xf32>
    %9 = math.tanh %8 : vector<16x128xf32>
    %c0_8 = arith.constant 0 : index
    %c0_9 = arith.constant 0 : index
    %10 = vector.load %arg3[%c0_8, %c0_9] : memref<128x128xf32, #tpu.memory_space<vmem>>, vector<128x128xf32>
    %cst_10 = arith.constant dense<0.000000e+00> : vector<16x128xf32>
    %11 = tpu.matmul %9, %10, %cst_10 {dimension_numbers = #tpu.dot_dimension_numbers<[1], [0], [0], [1], [0, 0, 1, 1], [], []>} : vector<16x128xf32>, vector<128x128xf32>, vector<16x128xf32> -> vector<16x128xf32>
    %12 = vector.broadcast %1 : vector<1x128xf32> to vector<16x128xf32>
    %13 = arith.addf %11, %12 : vector<16x128xf32>
    %14 = math.tanh %13 : vector<16x128xf32>
    %15 = vector.broadcast %2 : vector<1x128xf32> to vector<16x128xf32>
    %16 = arith.mulf %14, %15 : vector<16x128xf32>
    %cst_11 = arith.constant dense<0.000000e+00> : vector<16xf32>
    %17 = vector.multi_reduction <add>, %16, %cst_11 [1] : vector<16x128xf32> to vector<16xf32>
    %18 = vector.shape_cast %17 : vector<16xf32> to vector<16x1xf32>
    %19 = tpu.iota {dimensions = array<i32: 1>} : vector<16x128xi32>
    %c64_i32 = arith.constant 64 : i32
    %20 = vector.broadcast %c64_i32 : i32 to vector<16x128xi32>
    %21 = arith.cmpi eq, %19, %20 : vector<16x128xi32>
    %22 = vector.shape_cast %18 : vector<16x1xf32> to vector<16x1xf32>
    %23 = vector.broadcast %22 : vector<16x1xf32> to vector<16x128xf32>
    %24 = arith.select %21, %23, %14 : vector<16x128xi1>, vector<16x128xf32>
    %25 = vector.broadcast %3 : vector<1x128xf32> to vector<16x128xf32>
    %26 = arith.addf %24, %25 : vector<16x128xf32>
    %c0_12 = arith.constant 0 : index
    %c0_13 = arith.constant 0 : index
    %27 = vector.load %arg5[%c0_12, %c0_13] : memref<16x128xf32, #tpu.memory_space<vmem>>, vector<16x128xf32>
    tpu.vector_store %arg5[%c0_12, %c0_13], %26 {strides = array<i32>} : memref<16x128xf32, #tpu.memory_space<vmem>>, vector<16x128xf32>,
    return
  }
  func.func @transform_0(%arg0: i32) -> (i32, i32) {
    %c0_i32 = arith.constant 0 : i32
    %c0_i32_0 = arith.constant 0 : i32
    return %arg0, %c0_i32 : i32, i32
  }
  func.func @transform_1(%arg0: i32) -> (i32, i32) {
    %c0_i32 = arith.constant 0 : i32
    %c0_i32_0 = arith.constant 0 : i32
    %c0_i32_1 = arith.constant 0 : i32
    return %c0_i32, %c0_i32_0 : i32, i32
  }
  func.func @transform_2(%arg0: i32) -> (i32, i32) {
    %c0_i32 = arith.constant 0 : i32
    %c0_i32_0 = arith.constant 0 : i32
    %c0_i32_1 = arith.constant 0 : i32
    return %c0_i32, %c0_i32_0 : i32, i32
  }
  func.func @transform_3(%arg0: i32) -> (i32, i32) {
    %c0_i32 = arith.constant 0 : i32
    %c0_i32_0 = arith.constant 0 : i32
    %c0_i32_1 = arith.constant 0 : i32
    return %c0_i32, %c0_i32_0 : i32, i32
  }
  func.func @transform_4(%arg0: i32) -> (i32, i32) {
    %c0_i32 = arith.constant 0 : i32
    %c0_i32_0 = arith.constant 0 : i32
    return %arg0, %c0_i32 : i32, i32
  }
}

</mosaic_0001>

<bundles_post_ra>
// kernel: tpu_custom_call.1
= control target key start
LH: loop header
LB: loop body
LE: loop exit
PB: predicated region body
PF: predicated region fallthrough
CT: control target
= control target key end

     0   :  { %9 = vsyncpa [#allocation3], 0  ;;  %s568_s0 = inlined_call_operand.hbm [shape: f32[16,32], index: 0, kind: input, shape index: {}]   ;;  %s569_s1 = inlined_call_operand.hbm [shape: f32[32,128], index: 1, kind: input, shape index: {}]   ;;  %s570_s2 = inlined_call_operand.hbm [shape: f32[128,128], index: 2, kind: input, shape index: {}]   ;;  %s571_s3 = inlined_call_operand.hbm [shape: f32[8,128], index: 3, kind: input, shape index: {}]   ;;  %s572_s4 = inlined_call_operand.hbm [shape: f32[16,128], index: 4, kind: output, shape index: {}]  }
   0x1   :  { %10 = vsyncpa [#allocation6], 0 }
   0x2   :  { %11 = vsyncpa [#allocation9], 0 }
   0x3   :  { %12 = vsyncpa [#allocation4], 0  ;;  %s507_s15 = smov [#allocation5]   ;;  %s508_s17 = smov [#allocation2]  }
   0x4   :  { %s30_s16 = sshll.u32 %s507_s15, 4  ;;  %s18_s18 = sshll.u32 %s508_s17, 4  ;;  %s31_s16 = int_to_ptr.vmem [resolvable:$true] %s30_s16  ;;  %s19_s18 = int_to_ptr.vmem [resolvable:$true] %s18_s18 }
   0x5   :  { %s407_s19 = scalar_lea.vmem %s31_s16, 512  ;;  %p412_p1 = scmp.lt.s32.totalorder %s31_s16, %s31_s16 }
   0x6   :  { %p408_p0 = scmp.ne.s32.totalorder %s31_s16, %s407_s19  ;;  %p413_p2 = scmp.lt.s32.totalorder %s407_s19, %s407_s19 }
   0x8   :  { %p414_p3 = por %p413_p2, %p412_p1 }
   0xa   :  { %p415_p4 = pnand %p414_p3, %p408_p0 }
   0xc   :  { %418 = shalt.err (!%p415_p4)
}
   0xd   :  { %s509_s20 = smov 128   ;;  %s510_s21 = smov 8  }
   0xe   :  { %36 = dma.hbm_to_vmem [thread:$0]  %s569_s1, 512, %s31_s16, [#allocation6], %s509_s20, %s509_s20, %s510_s21  }
   0xf   :  { %s427_s24 = scalar_lea.vmem %s19_s18, 256  ;;  %p432_p6 = scmp.lt.s32.totalorder %s19_s18, %s19_s18 }
  0x10   :  { %p428_p5 = scmp.ne.s32.totalorder %s19_s18, %s427_s24  ;;  %p433_p7 = scmp.lt.s32.totalorder %s427_s24, %s427_s24 }
  0x12   :  { %p434_p8 = por %p433_p7, %p432_p6 }
  0x14   :  { %p435_p9 = pnand %p434_p8, %p428_p5 }
  0x16   :  { %438 = shalt.err (!%p435_p9)
}
  0x17   :  { %24 = dma.hbm_to_vmem [thread:$0]  %s568_s0, 256, %s19_s18, [#allocation3], %s509_s20, %s509_s20, %s510_s21  }
  0x18   :  { %s511_s27 = smov [#allocation7]   ;;  %s512_s29 = smov [#allocation8]  }
  0x19   :  { %s42_s28 = sshll.u32 %s511_s27, 4  ;;  %s55_s30 = sshll.u32 %s512_s29, 4  ;;  %s43_s28 = int_to_ptr.vmem [resolvable:$true] %s42_s28  ;;  %s56_s30 = int_to_ptr.vmem [resolvable:$true] %s55_s30 }
  0x1a   :  { %s447_s1 = scalar_lea.vmem %s43_s28, 2048  ;;  %p452_p11 = scmp.lt.s32.totalorder %s43_s28, %s43_s28 }
  0x1b   :  { %p448_p10 = scmp.ne.s32.totalorder %s43_s28, %s447_s1  ;;  %p453_p12 = scmp.lt.s32.totalorder %s447_s1, %s447_s1 }
  0x1d   :  { %p454_p13 = por %p453_p12, %p452_p11 }
  0x1f   :  { %p455_p0 = pnand %p454_p13, %p448_p10 }
  0x21   :  { %458 = shalt.err (!%p455_p0)
}
  0x22   :  { %48 = dma.hbm_to_vmem [thread:$0]  %s570_s2, 2048, %s43_s28, [#allocation6], %s509_s20, %s509_s20, %s510_s21  }
  0x23   :  { %s467_s0 = scalar_lea.vmem %s56_s30, 128  ;;  %p472_p2 = scmp.lt.s32.totalorder %s56_s30, %s56_s30 }
  0x24   :  { %p468_p1 = scmp.ne.s32.totalorder %s56_s30, %s467_s0  ;;  %p473_p3 = scmp.lt.s32.totalorder %s467_s0, %s467_s0 }
  0x26   :  { %p474_p4 = por %p473_p3, %p472_p2 }
  0x28   :  { %p475_p5 = pnand %p474_p4, %p468_p1 }
  0x2a   :  { %478 = shalt.err (!%p475_p5)
}
  0x2b   :  { %58 = dma.hbm_to_vmem [thread:$0]  %s571_s3, 128, %s56_s30, [#allocation9]  }
  0x2c   :  { %499 = dma.done.wait [#allocation3], 256  }
  0x2d   :  { %500 = vsyncadd [#allocation3], 4294967040 }
  0x2e   :  { %501 = dma.done.wait [#allocation6], 2560  }
  0x2f   :  { %502 = vsyncadd [#allocation6], 4294964736 }
  0x30   :  { %503 = dma.done.wait [#allocation9], 128  }
  0x31   :  { %504 = vsyncadd [#allocation9], 4294967168  ;;  %vm85_vm0 = vcmask 261120   ;;  %v80_v0 = vld [vmem:[#allocation5 + $0x18] sm:$0xff]  ;;  %v79_v1 = vld [vmem:[#allocation5 + $0x10] sm:$0xff]  ;;  %v276_v39 = vlaneseq  ;;  %s513_s2 = smov [#allocation10]  }
  0x32   :  { %338 = vmatprep.subr.mxu0 %v80_v0  ;;  %v75_v2 = vld [vmem:[#allocation2] sm:$0xff]  ;;  %v78_v3 = vld [vmem:[#allocation5 + $0x8] sm:$0xff]  ;;  %v184_v4 = vld [vmem:[#allocation7 + $0x78] sm:$0xff]  ;;  %s294_s3 = sshll.u32 %s513_s2, 4  ;;  %s295_s3 = int_to_ptr.vmem [resolvable:$true] %s294_s3 }
  0x33   :  { %339 = vmatpush3.msra.mxu0 %v80_v0  ;;  %346 = vmatprep.mubr.msk.f32.mxu0 %vm85_vm0, %v75_v2  ;;  %v183_v5 = vld [vmem:[#allocation7 + $0x70] sm:$0xff]  ;;  %v77_v6 = vld [vmem:[#allocation5] sm:$0xff]  ;;  %v182_v7 = vld [vmem:[#allocation7 + $0x68] sm:$0xff]  ;;  %v277_v40 = vand.u32 127, %v276_v39  ;;  %s479_s9 = scalar_lea.vmem %s295_s3, 256  ;;  %p484_p7 = scmp.lt.s32.totalorder %s295_s3, %s295_s3 }
  0x34   :  { %340 = vmatprep.subr.mxu0 %v79_v1  ;;  %349 = vmatprep.subr.mxu1 %v184_v4  ;;  %v76_v8 = vld [vmem:[#allocation2 + $0x8] sm:$0xff]  ;;  %v181_v9 = vld [vmem:[#allocation7 + $0x60] sm:$0xff]  ;;  %v179_v11 = vld [vmem:[#allocation7 + $0x50] sm:$0xff]  ;;  %p480_p6 = scmp.ne.s32.totalorder %s295_s3, %s479_s9  ;;  %p485_p8 = scmp.lt.s32.totalorder %s479_s9, %s479_s9 }
  0x35   :  { %341 = vmatpush3.msra.mxu0 %v79_v1  ;;  %350 = vmatpush3.msra.mxu1 %v184_v4  ;;  %v180_v10 = vld [vmem:[#allocation7 + $0x58] sm:$0xff]  ;;  %v178_v12 = vld [vmem:[#allocation7 + $0x48] sm:$0xff]  ;;  %v177_v13 = vld [vmem:[#allocation7 + $0x40] sm:$0xff]  ;;  %vm278_vm1 = vcmp.eq.s32.totalorder %v277_v40, 64 }
  0x36   :  { %342 = vmatprep.subr.mxu0 %v78_v3  ;;  %351 = vmatprep.subr.mxu1 %v183_v5  ;;  %v176_v14 = vld [vmem:[#allocation7 + $0x38] sm:$0xff]  ;;  %v175_v15 = vld [vmem:[#allocation7 + $0x30] sm:$0xff]  ;;  %v174_v16 = vld [vmem:[#allocation7 + $0x28] sm:$0xff]  ;;  %p486_p9 = por %p485_p8, %p484_p7 }
  0x37   :  { %343 = vmatpush3.msra.mxu0 %v78_v3  ;;  %352 = vmatpush3.msra.mxu1 %v183_v5  ;;  %v173_v17 = vld [vmem:[#allocation7 + $0x20] sm:$0xff]  ;;  %v172_v18 = vld [vmem:[#allocation7 + $0x18] sm:$0xff]  ;;  %v171_v19 = vld [vmem:[#allocation7 + $0x10] sm:$0xff] }
  0x38   :  { %344 = vmatprep.subr.mxu0 %v77_v6  ;;  %353 = vmatprep.subr.mxu1 %v182_v7  ;;  %v170_v20 = vld [vmem:[#allocation7 + $0x8] sm:$0xff]  ;;  %v169_v21 = vld [vmem:[#allocation7] sm:$0xff]  ;;  %p487_p10 = pnand %p486_p9, %p480_p6 }
  0x39   :  { %345 = vmatpush3.msra.mxu0 %v77_v6  ;;  %354 = vmatpush3.msra.mxu1 %v182_v7  ;;  %v308_v22 = vld [vmem:[#allocation8] ss:$0 sm:$0xff]  ;;  %v311_v30 = vld [vmem:[#allocation8 + $0x1] ss:$0 sm:$0xff]  ;;  %v312_v35 = vld [vmem:[#allocation8 + $0x2] ss:$0 sm:$0xff] }
  0x3a   :  { %347 = vmatmul.mubr.msk.f32.vlgmr.msra.gmra.mxu0 %vm85_vm0, %v76_v8  ;;  %355 = vmatprep.subr.mxu1 %v181_v9  ;;  %v313_v41 = vld [vmem:[#allocation8 + $0x3] ss:$0 sm:$0xff] }
  0x3b   :  { %356 = vmatpush3.msra.mxu1 %v181_v9 }
  0x3c   :  { %357 = vmatprep.subr.mxu1 %v180_v10 }
  0x3d   :  { %358 = vmatpush3.msra.mxu1 %v180_v10 }
  0x3e   :  { %359 = vmatprep.subr.mxu1 %v179_v11 }
  0x3f   :  { %360 = vmatpush3.msra.mxu1 %v179_v11 }
  0x40   :  { %361 = vmatprep.subr.mxu1 %v178_v12 }
  0x41   :  { %362 = vmatpush3.msra.mxu1 %v178_v12 }
  0x42   :  { %363 = vmatprep.subr.mxu1 %v177_v13 }
  0x43   :  { %364 = vmatpush3.msra.mxu1 %v177_v13 }
  0x44   :  { %365 = vmatprep.subr.mxu1 %v176_v14 }
  0x45   :  { %366 = vmatpush3.msra.mxu1 %v176_v14 }
  0x46   :  { %367 = vmatprep.subr.mxu1 %v175_v15 }
  0x47   :  { %368 = vmatpush3.msra.mxu1 %v175_v15 }
  0x48   :  { %369 = vmatprep.subr.mxu1 %v174_v16 }
  0x49   :  { %370 = vmatpush3.msra.mxu1 %v174_v16 }
  0x4a   :  { %371 = vmatprep.subr.mxu1 %v173_v17 }
  0x4b   :  { %372 = vmatpush3.msra.mxu1 %v173_v17 }
  0x4c   :  { %373 = vmatprep.subr.mxu1 %v172_v18 }
  0x4d   :  { %374 = vmatpush3.msra.mxu1 %v172_v18 }
  0x4e   :  { %375 = vmatprep.subr.mxu1 %v171_v19 }
  0x4f   :  { %376 = vmatpush3.msra.mxu1 %v171_v19 }
  0x50   :  { %377 = vmatprep.subr.mxu1 %v170_v20 }
  0x51   :  { %378 = vmatpush3.msra.mxu1 %v170_v20 }
  0x52   :  { %379 = vmatprep.subr.mxu1 %v169_v21 }
  0x53   :  { %380 = vmatpush3.msra.mxu1 %v169_v21 }
  0xfa   :  { %v348_v23 = vpop.f32.mrf.mxu0 }
  0xfb   :  { %v164_v24 = vadd.f32 %v348_v23, %v308_v22 }
  0xfc   :  { %v158_v25 = vpop.f32.mrf.mxu0 }
  0xfd   :  { %v159_v26 = vadd.f32 %v308_v22, %v158_v25 }
  0xff   :  { %391 = vtanh.f32 %v159_v26 }
 0x100   :  { %393 = vtanh.f32 %v164_v24 }
 0x10c   :  { %v392_v27 = vpop.eup %391 }
 0x10d   :  { %v394_v28 = vpop.eup %393  ;;  %381 = vmatprep.mubr.f32.mxu1 %v392_v27 }
 0x10e   :  { %382 = vmatmul.mubr.f32.vlgmr.msra.gmra.mxu1 %v394_v28 }
 0x1ce   :  { %v383_v29 = vpop.f32.mrf.mxu1 }
 0x1cf   :  { %v261_v32 = vadd.f32 %v383_v29, %v311_v30 }
 0x1d0   :  { %v255_v31 = vpop.f32.mrf.mxu1 }
 0x1d1   :  { %v256_v33 = vadd.f32 %v311_v30, %v255_v31 }
 0x1d3   :  { %395 = vtanh.f32 %v256_v33 }
 0x1d4   :  { %397 = vtanh.f32 %v261_v32 }
 0x1e0   :  { %v396_v34 = vpop.eup %395 }
 0x1e1   :  { %v270_v36 = vmul.f32 %v396_v34, %v312_v35  ;;  %v398_v37 = vpop.eup %397 }
 0x1e2   :  { %v271_v38 = vmul.f32 %v398_v37, %v312_v35 }
 0x1e3   :  { %272 = vadd.xlane.f32.xlu0 %v270_v36 }
 0x1e7   :  { %274 = vadd.xlane.f32.xlu0 %v271_v38 }
 0x26c   :  { %v273_v42 = vpop.xlane.xlu0 %272 }
 0x26d   :  { %v279_v43 = vsel %vm278_vm1, %v273_v42, %v396_v34 }
 0x26e   :  { %v285_v44 = vadd.f32 %v313_v41, %v279_v43 }
 0x270   :  { %287 = vst [vmem:[#allocation10] sm:$0xff] %v285_v44  ;;  %v275_v45 = vpop.xlane.xlu0 %274 }
 0x271   :  { %v280_v46 = vsel %vm278_vm1, %v275_v45, %v398_v37 }
 0x272   :  { %v286_v47 = vadd.f32 %v313_v41, %v280_v46 }
 0x274   :  { %288 = vst [vmem:[#allocation10 + $0x8] sm:$0xff] %v286_v47 }
 0x275   :  { %490 = shalt.err (!%p487_p10)
}
 0x276   :  { %300 = dma.vmem_to_hbm [thread:$0]  %s295_s3, 256, %s572_s4, [#allocation4], %s509_s20, %s509_s20, %s510_s21  }
 0x277   :  { %505 = dma.done.wait [#allocation4], 256  }
 0x278   :  { %506 = vsyncadd [#allocation4], 4294967040 }
 0x279   :  { %304 = vsyncpa [#allocation3], 1 }
 0x27a   :  { %305 = vsyncpa [#allocation6], 1 }
 0x27b   :  { %306 = vsyncpa [#allocation9], 1 }
 0x27c   :  { %307 = vsyncpa [#allocation4], 1 }

</bundles_post_ra>
